<compile_context>
chip_gen: v7x
topology: tpu7x:2x2x1
jax: 0.10.0
libtpu: 0.0.40
codegen_flags: <defaults>
</compile_context>

<pallas_src>
import functools

import jax
import jax.numpy as jnp
from jax.experimental import pallas as pl
from jax.experimental.pallas import tpu as pltpu

E_PAD = 128   # padded embed dim (lane-aligned)
H_PAD = 128   # padded hidden dim (lane-aligned)


# ----------------------------- Pallas kernels -----------------------------

def encoder_kernel(p_ref, cw_ref, ew_ref, eb_ref, gam_ref, bet_ref, o_ref):
    # Fused: conv-as-matmul (bf16 MXU, f32 acc) + ReLU + global average pool
    #        + Linear(feat->embed) + BatchNorm1d (training-mode batch stats).
    B = o_ref.shape[0]
    F = cw_ref.shape[1]
    HW = p_ref.shape[0] // B
    z = jnp.dot(p_ref[...], cw_ref[...], preferred_element_type=jnp.float32)  # (B*HW, F)
    z = jnp.maximum(z, 0.0)                                                    # ReLU
    feats = jnp.mean(z.reshape(B, HW, F), axis=1)                              # GAP (B, F)
    z2 = jnp.dot(feats, ew_ref[...], preferred_element_type=jnp.float32) + eb_ref[...]
    mu = jnp.mean(z2, axis=0, keepdims=True)
    var = jnp.mean((z2 - mu) ** 2, axis=0, keepdims=True)   # biased var, like torch BN fwd
    o_ref[...] = gam_ref[...] * (z2 - mu) * jax.lax.rsqrt(var + 1e-5) + bet_ref[...]


def lstm_stack_kernel(seq_ref, wih_ref, whh_ref, b_ref, out_ref, x_scr, g_scr, *, batch):
    # Entire multi-layer LSTM in one kernel; sequence is time-major flattened
    # (rows = (T+1)*batch).  Gate order i,f,g,o (PyTorch).  H padded to 128 so every
    # gate slice is a lane-aligned 128-wide block.  Weights bf16, state/gates f32.
    rows, Hh = seq_ref.shape                    # Hh = H_PAD
    T1 = rows // batch
    L = wih_ref.shape[0]
    for l in range(L):                          # static layer loop
        src = seq_ref if l == 0 else x_scr
        dst = out_ref if l == L - 1 else x_scr
        # Hoisted input projection: ONE big matmul + ONE bias broadcast per layer.
        g_scr[...] = (jnp.dot(src[...].astype(jnp.bfloat16), wih_ref[l],
                              preferred_element_type=jnp.float32) + b_ref[l])
        whh_l = whh_ref[l]                      # bf16, loaded once per layer
        h = jnp.zeros((batch, Hh), jnp.float32)
        c = jnp.zeros((batch, Hh), jnp.float32)
        for t in range(T1):                     # short static recurrence, fully unrolled
            gates = g_scr[t * batch:(t + 1) * batch, :] + jnp.dot(
                h.astype(jnp.bfloat16), whh_l, preferred_element_type=jnp.float32)
            i = jax.nn.sigmoid(gates[:, 0 * Hh:1 * Hh])
            f = jax.nn.sigmoid(gates[:, 1 * Hh:2 * Hh])
            g = jnp.tanh(gates[:, 2 * Hh:3 * Hh])
            o = jax.nn.sigmoid(gates[:, 3 * Hh:4 * Hh])
            c = f * c + i * g
            h = o * jnp.tanh(c)
            dst[t * batch:(t + 1) * batch, :] = h      # lane-dense 128-wide store


def out_proj_kernel(x_ref, w_ref, b_ref, o_ref):
    o_ref[...] = (jnp.dot(x_ref[...], w_ref[...],
                          preferred_element_type=jnp.float32) + b_ref[...])


# ----------------------------- wrappers -----------------------------------

def encoder_fused(patches_flat, batch, conv_w, enc_w, enc_b, gamma, beta):
    return pl.pallas_call(
        encoder_kernel,
        out_shape=jax.ShapeDtypeStruct((batch, E_PAD), jnp.float32),
    )(patches_flat, conv_w, enc_w, enc_b, gamma, beta)


def lstm_stack(x_flat, wih, whh, b, batch):
    rows = x_flat.shape[0]
    Hh = whh.shape[1]                           # = H_PAD
    kernel = functools.partial(lstm_stack_kernel, batch=batch)
    return pl.pallas_call(
        kernel,
        out_shape=jax.ShapeDtypeStruct((rows, Hh), jnp.float32),
        scratch_shapes=[pltpu.VMEM((rows, Hh), jnp.float32),      # inter-layer buffer
                        pltpu.VMEM((rows, 4 * Hh), jnp.float32)], # hoisted gate preacts
    )(x_flat, wih, whh, b)


def out_proj(x, w, b):
    N, Hp = x.shape
    Vp = w.shape[1]                             # already padded to a multiple of 128
    TV = 512 if Vp % 512 == 0 else (256 if Vp % 256 == 0 else 128)
    return pl.pallas_call(
        out_proj_kernel,
        out_shape=jax.ShapeDtypeStruct((N, Vp), jnp.float32),
        grid=(Vp // TV,),
        in_specs=[pl.BlockSpec((N, Hp), lambda j: (0, 0)),
                  pl.BlockSpec((Hp, TV), lambda j: (0, j)),
                  pl.BlockSpec((1, TV), lambda j: (0, j))],
        out_specs=pl.BlockSpec((N, TV), lambda j: (0, j)),
        compiler_params=pltpu.CompilerParams(dimension_semantics=("parallel",)),
    )(x, w, b)


# --------------------------- parameter setup -------------------------------

def _pad_gates(w, in_real, in_pad, h_real, h_pad):
    # (in_real, 4*h_real) -> (in_pad, 4*h_pad); each gate block zero-padded so padded
    # hidden units stay exactly zero and real units stay bit-identical.
    w4 = w.reshape(in_real, 4, h_real)
    out = jnp.zeros((in_pad, 4, h_pad), w.dtype)
    out = out.at[:in_real, :, :h_real].set(w4)
    return out.reshape(in_pad, 4 * h_pad)


def init_params(key, c_in, feat_dim, embed_size, hidden_size, vocab_size, num_layers):
    assert E_PAD == H_PAD  # lets layer-0 and later-layer Wih stack together
    keys = jax.random.split(key, 8 + 3 * num_layers)
    s = 0.1
    p = {}

    kc = 9 * c_in
    kp = -(-kc // 16) * 16                                     # pad K only to bf16 sublane
    conv_w = s * jax.random.normal(keys[0], (kc, feat_dim), jnp.float32)
    p["conv_w"] = jnp.pad(conv_w, ((0, kp - kc), (0, 0))).astype(jnp.bfloat16)

    enc_w = s * jax.random.normal(keys[1], (feat_dim, embed_size), jnp.float32)
    enc_b = s * jax.random.normal(keys[2], (1, embed_size), jnp.float32)
    p["enc_w"] = jnp.pad(enc_w, ((0, 0), (0, E_PAD - embed_size)))
    p["enc_b"] = jnp.pad(enc_b, ((0, 0), (0, E_PAD - embed_size)))
    p["bn_gamma"] = jnp.ones((1, E_PAD), jnp.float32)
    p["bn_beta"] = jnp.zeros((1, E_PAD), jnp.float32)

    emb = s * jax.random.normal(keys[3], (vocab_size, embed_size), jnp.float32)
    p["embed_table"] = jnp.pad(emb, ((0, 0), (0, E_PAD - embed_size)))

    wihs, whhs, bs = [], [], []
    for l in range(num_layers):
        in_sz = embed_size if l == 0 else hidden_size
        in_pad = E_PAD if l == 0 else H_PAD
        wih = s * jax.random.normal(keys[4 + 3 * l], (in_sz, 4 * hidden_size), jnp.float32)
        whh = s * jax.random.normal(keys[5 + 3 * l], (hidden_size, 4 * hidden_size), jnp.float32)
        b = s * jax.random.normal(keys[6 + 3 * l], (1, 4 * hidden_size), jnp.float32)
        wihs.append(_pad_gates(wih, in_sz, in_pad, hidden_size, H_PAD))
        whhs.append(_pad_gates(whh, hidden_size, H_PAD, hidden_size, H_PAD))
        bs.append(_pad_gates(b, 1, 1, hidden_size, H_PAD))
    p["lstm_wih"] = jnp.stack(wihs).astype(jnp.bfloat16)   # (L, 128, 512) bf16
    p["lstm_whh"] = jnp.stack(whhs).astype(jnp.bfloat16)   # (L, 128, 512) bf16
    p["lstm_b"] = jnp.stack(bs)                            # (L, 1, 512) f32

    vpad = -(-vocab_size // 128) * 128
    out_w = s * jax.random.normal(keys[4 + 3 * num_layers], (hidden_size, vocab_size),
                                  jnp.float32)
    out_b = s * jax.random.normal(keys[5 + 3 * num_layers], (1, vocab_size), jnp.float32)
    p["out_w"] = jnp.pad(out_w, ((0, H_PAD - hidden_size),
                                 (0, vpad - vocab_size))).astype(jnp.bfloat16)
    p["out_b"] = jnp.pad(out_b, ((0, 0), (0, vpad - vocab_size)))
    return p


# --------------------------- forward pass ----------------------------------

def image_captioning_forward(params, images_nchw, captions, lengths):
    B, C, Himg, Wimg = images_nchw.shape
    HW = Himg * Wimg
    V = params["embed_table"].shape[0]

    # ----- encoder: im2col (wrapper glue, bf16, K padded only to 16) + fused kernel -----
    x = jnp.transpose(images_nchw, (0, 2, 3, 1))                     # NCHW -> NHWC
    xp = jnp.pad(x, ((0, 0), (1, 1), (1, 1), (0, 0)))
    patches = jnp.concatenate(
        [xp[:, i:i + Himg, j:j + Wimg, :] for i in range(3) for j in range(3)], axis=-1)
    patches = patches.reshape(B * HW, 9 * C)
    kp = params["conv_w"].shape[0]
    patches = jnp.pad(patches, ((0, 0), (0, kp - 9 * C))).astype(jnp.bfloat16)

    features = encoder_fused(patches, B, params["conv_w"], params["enc_w"],
                             params["enc_b"], params["bn_gamma"], params["bn_beta"])

    # ----- decoder: embedding lookup (glue) + single fused multi-layer LSTM kernel -----
    emb = params["embed_table"][captions]                            # (B, T, E_PAD)
    seq = jnp.concatenate([features[:, None, :], emb], axis=1)       # (B, T+1, E_PAD)
    T1 = seq.shape[1]
    x_tm = jnp.transpose(seq, (1, 0, 2)).reshape(T1 * B, E_PAD)      # time-major flat

    hidden = lstm_stack(x_tm, params["lstm_wih"], params["lstm_whh"],
                        params["lstm_b"], B)                         # (T1*B, H_PAD)

    # pack_padded_sequence (batch_first, sorted lengths): time-major packed order.
    # TODO(synk): lengths must stay a static Python list (indices built at trace time).
    idx = [t * B + b for t in range(T1) for b in range(B) if t < lengths[b]]
    packed = hidden[jnp.array(idx, jnp.int32)].astype(jnp.bfloat16)  # (sum(lengths), H_PAD)

    logits = out_proj(packed, params["out_w"], params["out_b"])      # (sum(lengths), Vpad)
    return logits[:, :V]


# --------------------------------- main -------------------------------------

if __name__ == "__main__":
    B, C, Himg, Wimg = 2, 4, 16, 16
    feat_dim = 128          # stands in for resnet.fc.in_features (2048)
    embed_size = 32
    hidden_size = 32
    vocab_size = 128
    num_layers = 2
    T = 8                   # caption length -> LSTM sequence length T+1 = 9
    lengths = [9, 7]        # sorted descending, as required by pack_padded_sequence

    key = jax.random.PRNGKey(0)
    k_img, k_cap, k_par = jax.random.split(key, 3)

    images = jax.random.normal(k_img, (B, C, Himg, Wimg), jnp.float32)      # NCHW
    captions = jax.random.randint(k_cap, (B, T), 0, vocab_size, jnp.int32)
    params = init_params(k_par, C, feat_dim, embed_size, hidden_size,
                         vocab_size, num_layers)

    outputs = image_captioning_forward(params, images, captions, lengths)
    outputs = jax.block_until_ready(outputs)

    expected = (sum(lengths), vocab_size)
    assert outputs.shape == expected, (outputs.shape, expected)
    assert bool(jnp.all(jnp.isfinite(outputs)))
    print("KERNEL_OK")
</pallas_src>

<mosaic_0001>
module attributes {stable_mosaic.version = 11 : i64} {
  func.func @encoder_kernel(%arg0: memref<512x48xbf16, #tpu.memory_space<vmem>>, %arg1: memref<48x128xbf16, #tpu.memory_space<vmem>>, %arg2: memref<128x128xf32, #tpu.memory_space<vmem>>, %arg3: memref<1x128xf32, #tpu.memory_space<vmem>>, %arg4: memref<1x128xf32, #tpu.memory_space<vmem>>, %arg5: memref<1x128xf32, #tpu.memory_space<vmem>>, %arg6: memref<2x128xf32, #tpu.memory_space<vmem>>) attributes {dimension_semantics = [], scalar_prefetch = 0 : i64, scratch_operands = 0 : i64, tpu.core_type = #tpu.core_type<tc>} {
    %c0 = arith.constant 0 : index
    %c0_0 = arith.constant 0 : index
    %0 = vector.load %arg0[%c0, %c0_0] : memref<512x48xbf16, #tpu.memory_space<vmem>>, vector<512x48xbf16>
    %c0_1 = arith.constant 0 : index
    %c0_2 = arith.constant 0 : index
    %1 = vector.load %arg1[%c0_1, %c0_2] : memref<48x128xbf16, #tpu.memory_space<vmem>>, vector<48x128xbf16>
    %cst = arith.constant dense<0.000000e+00> : vector<512x128xf32>
    %2 = tpu.matmul %0, %1, %cst {dimension_numbers = #tpu.dot_dimension_numbers<[1], [0], [0], [1], [0, 0, 1, 1], [], []>} : vector<512x48xbf16>, vector<48x128xbf16>, vector<512x128xf32> -> vector<512x128xf32>
    %cst_3 = arith.constant 0.000000e+00 : f32
    %3 = vector.broadcast %cst_3 : f32 to vector<512x128xf32>
    %4 = arith.maximumf %2, %3 : vector<512x128xf32>
    %5 = vector.shape_cast %4 : vector<512x128xf32> to vector<2x256x128xf32>
    %cst_4 = arith.constant dense<0.000000e+00> : vector<2x128xf32>
    %6 = vector.multi_reduction <add>, %5, %cst_4 [1] : vector<2x256x128xf32> to vector<2x128xf32>
    %cst_5 = arith.constant 2.560000e+02 : f32
    %7 = vector.broadcast %cst_5 : f32 to vector<2x128xf32>
    %8 = arith.divf %6, %7 : vector<2x128xf32>
    %c0_6 = arith.constant 0 : index
    %c0_7 = arith.constant 0 : index
    %9 = vector.load %arg2[%c0_6, %c0_7] : memref<128x128xf32, #tpu.memory_space<vmem>>, vector<128x128xf32>
    %cst_8 = arith.constant dense<0.000000e+00> : vector<2x128xf32>
    %10 = tpu.matmul %8, %9, %cst_8 {dimension_numbers = #tpu.dot_dimension_numbers<[1], [0], [0], [1], [0, 0, 1, 1], [], []>} : vector<2x128xf32>, vector<128x128xf32>, vector<2x128xf32> -> vector<2x128xf32>
    %c0_9 = arith.constant 0 : index
    %c0_10 = arith.constant 0 : index
    %11 = vector.load %arg3[%c0_9, %c0_10] : memref<1x128xf32, #tpu.memory_space<vmem>>, vector<1x128xf32>
    %12 = vector.broadcast %11 : vector<1x128xf32> to vector<2x128xf32>
    %13 = arith.addf %10, %12 : vector<2x128xf32>
    %cst_11 = arith.constant dense<0.000000e+00> : vector<128xf32>
    %14 = vector.multi_reduction <add>, %13, %cst_11 [0] : vector<2x128xf32> to vector<128xf32>
    %15 = vector.shape_cast %14 : vector<128xf32> to vector<1x128xf32>
    %cst_12 = arith.constant 2.000000e+00 : f32
    %16 = vector.broadcast %cst_12 : f32 to vector<1x128xf32>
    %17 = arith.divf %15, %16 : vector<1x128xf32>
    %18 = vector.broadcast %17 : vector<1x128xf32> to vector<2x128xf32>
    %19 = arith.subf %13, %18 : vector<2x128xf32>
    %20 = arith.mulf %19, %19 : vector<2x128xf32>
    %cst_13 = arith.constant dense<0.000000e+00> : vector<128xf32>
    %21 = vector.multi_reduction <add>, %20, %cst_13 [0] : vector<2x128xf32> to vector<128xf32>
    %22 = vector.shape_cast %21 : vector<128xf32> to vector<1x128xf32>
    %cst_14 = arith.constant 2.000000e+00 : f32
    %23 = vector.broadcast %cst_14 : f32 to vector<1x128xf32>
    %24 = arith.divf %22, %23 : vector<1x128xf32>
    %c0_15 = arith.constant 0 : index
    %c0_16 = arith.constant 0 : index
    %25 = vector.load %arg4[%c0_15, %c0_16] : memref<1x128xf32, #tpu.memory_space<vmem>>, vector<1x128xf32>
    %26 = vector.broadcast %17 : vector<1x128xf32> to vector<2x128xf32>
    %27 = arith.subf %13, %26 : vector<2x128xf32>
    %28 = vector.broadcast %25 : vector<1x128xf32> to vector<2x128xf32>
    %29 = arith.mulf %28, %27 : vector<2x128xf32>
    %cst_17 = arith.constant 9.99999974E-6 : f32
    %30 = vector.broadcast %cst_17 : f32 to vector<1x128xf32>
    %31 = arith.addf %24, %30 : vector<1x128xf32>
    %32 = math.rsqrt %31 : vector<1x128xf32>
    %33 = vector.broadcast %32 : vector<1x128xf32> to vector<2x128xf32>
    %34 = arith.mulf %29, %33 : vector<2x128xf32>
    %c0_18 = arith.constant 0 : index
    %c0_19 = arith.constant 0 : index
    %35 = vector.load %arg5[%c0_18, %c0_19] : memref<1x128xf32, #tpu.memory_space<vmem>>, vector<1x128xf32>
    %36 = vector.broadcast %35 : vector<1x128xf32> to vector<2x128xf32>
    %37 = arith.addf %34, %36 : vector<2x128xf32>
    %c0_20 = arith.constant 0 : index
    %c0_21 = arith.constant 0 : index
    %38 = vector.load %arg6[%c0_20, %c0_21] : memref<2x128xf32, #tpu.memory_space<vmem>>, vector<2x128xf32>
    tpu.vector_store %arg6[%c0_20, %c0_21], %37 {strides = array<i32>} : memref<2x128xf32, #tpu.memory_space<vmem>>, vector<2x128xf32>,
    return
  }
}

</mosaic_0001>

<bundles_post_ra>
// kernel: tpu_custom_call.1
= control target key start
LH: loop header
LB: loop body
LE: loop exit
PB: predicated region body
PF: predicated region fallthrough
CT: control target
= control target key end

     0   :  { %vm273_vm0 = vcmask 392192   ;;  %s1603_s0 = inlined_call_operand.vmem [shape: bf16[512,48], index: 0, kind: input, shape index: {}]   ;;  %s1604_s1 = inlined_call_operand.vmem [shape: bf16[48,128], index: 1, kind: input, shape index: {}]   ;;  %s1605_s2 = inlined_call_operand.vmem [shape: f32[128,128], index: 2, kind: input, shape index: {}]   ;;  %s1606_s3 = inlined_call_operand.vmem [shape: f32[1,128], index: 3, kind: input, shape index: {}]   ;;  %s1607_s4 = inlined_call_operand.vmem [shape: f32[1,128], index: 4, kind: input, shape index: {}]   ;;  %s1608_s5 = inlined_call_operand.vmem [shape: f32[1,128], index: 5, kind: input, shape index: {}]   ;;  %s1609_s6 = inlined_call_operand.hbm [shape: f32[2,128], index: 6, kind: output, shape index: {}]  }
   0x1   :  { %v1213_v0 = vld [vmem:[%s1604_s1] sm:$0xff]   ;;  %v1214_v1 = vld [vmem:[%s1604_s1 + $0x8] sm:$0xff]   ;;  %v1215_v3 = vld [vmem:[%s1604_s1 + $0x10] sm:$0xff]  }
   0x2   :  { %1074 = vmatprep.subr.bf16.mxu0 %v1213_v0  ;;  %1203 = vmatprep.subr.bf16.mxu1 %v1213_v0  ;;  %v1216_v2 = vld [vmem:[%s1603_s0] sm:$0xff]   ;;  %v1217_v4 = vld [vmem:[%s1603_s0 + $0x8] sm:$0xff]   ;;  %v1218_v5 = vld [vmem:[%s1603_s0 + $0x10] sm:$0xff]  }
   0x3   :  { %1075 = vmatpush3.bf16.msra.mxu0 %v1213_v0  ;;  %1206 = vmatpush3.bf16.msra.mxu1 %v1213_v0  ;;  %v1219_v6 = vld [vmem:[%s1603_s0 + $0x18] sm:$0xff]   ;;  %v1220_v7 = vld [vmem:[%s1603_s0 + $0x20] sm:$0xff]   ;;  %v1234_v8 = vld [vmem:[%s1603_s0 + $0x90] sm:$0xff]  }
   0x4   :  { %1076 = vmatprep.subr.bf16.mxu0 %v1214_v1  ;;  %1204 = vmatprep.subr.bf16.mxu1 %v1214_v1  ;;  %v1235_v9 = vld [vmem:[%s1603_s0 + $0x98] sm:$0xff]   ;;  %v1236_v10 = vld [vmem:[%s1603_s0 + $0xa0] sm:$0xff]   ;;  %v1221_v11 = vld [vmem:[%s1603_s0 + $0x28] sm:$0xff]  }
   0x5   :  { %1080 = vmatprep.mubr.msk.bf16.mxu0 %vm273_vm0, %v1216_v2  ;;  %1116 = vmatprep.mubr.msk.bf16.mxu1 %vm273_vm0, %v1234_v8  ;;  %v1222_v12 = vld [vmem:[%s1603_s0 + $0x30] sm:$0xff]   ;;  %v1237_v13 = vld [vmem:[%s1603_s0 + $0xa8] sm:$0xff]   ;;  %v1223_v15 = vld [vmem:[%s1603_s0 + $0x38] sm:$0xff]  }
   0x6   :  { %v1238_v14 = vld [vmem:[%s1603_s0 + $0xb0] sm:$0xff]   ;;  %v1224_v16 = vld [vmem:[%s1603_s0 + $0x40] sm:$0xff]  }
   0x7   :  { %1077 = vmatpush3.bf16.msra.mxu0 %v1214_v1  ;;  %1207 = vmatpush3.bf16.msra.mxu1 %v1214_v1 }
   0x8   :  { %1078 = vmatprep.subr.bf16.mxu0 %v1215_v3  ;;  %1205 = vmatprep.subr.bf16.mxu1 %v1215_v3 }
   0xb   :  { %1079 = vmatpush3.bf16.msra.mxu0 %v1215_v3  ;;  %1208 = vmatpush3.bf16.msra.mxu1 %v1215_v3 }
   0xe   :  { %1081 = vmatmul.mubr.msk.bf16.vlgmr.msra.gmra.mrb[0].mxu0 %vm273_vm0, %v1217_v4  ;;  %1117 = vmatmul.mubr.msk.bf16.vlgmr.msra.gmra.mrb[0].mxu1 %vm273_vm0, %v1235_v9 }
   0xf   :  { %1084 = vmatprep.mubr.msk.bf16.mxu0 %vm273_vm0, %v1218_v5  ;;  %1120 = vmatprep.mubr.msk.bf16.mxu1 %vm273_vm0, %v1236_v10 }
  0x16   :  { %1085 = vmatmul.mubr.msk.bf16.gmra.mrb[4].mxu0 %vm273_vm0, %v1219_v6  ;;  %1121 = vmatmul.mubr.msk.bf16.gmra.mrb[4].mxu1 %vm273_vm0, %v1237_v13 }
  0x17   :  { %1088 = vmatprep.mubr.msk.bf16.mxu0 %vm273_vm0, %v1220_v7  ;;  %1124 = vmatprep.mubr.msk.bf16.mxu1 %vm273_vm0, %v1238_v14 }
  0x1e   :  { %1089 = vmatmul.mubr.msk.bf16.gmra.mrb[8].mxu0 %vm273_vm0, %v1221_v11 }
  0x1f   :  { %1092 = vmatprep.mubr.msk.bf16.mxu0 %vm273_vm0, %v1222_v12 }
  0x20   :  { %11 = vsyncpa [#allocation3], 0  ;;  %v1239_v17 = vld [vmem:[%s1603_s0 + $0xb8] sm:$0xff]   ;;  %v1240_v18 = vld [vmem:[%s1603_s0 + $0xc0] sm:$0xff]   ;;  %v1274_v37 = vmov 0.0|0.0   ;;  %vm1275_vm1 = vmmov 0  }
  0x21   :  { %1125 = vmatmul.mubr.msk.bf16.gmra.mrb[8].mxu1 %vm273_vm0, %v1239_v17  ;;  %v1225_v19 = vld [vmem:[%s1603_s0 + $0x48] sm:$0xff]   ;;  %v1226_v20 = vld [vmem:[%s1603_s0 + $0x50] sm:$0xff]   ;;  %v1227_v23 = vld [vmem:[%s1603_s0 + $0x58] sm:$0xff]   ;;  %1179 = vmatprep.subr.bf16.mxu1 %v1274_v37  ;;  %vm825_vm2 = vcmask 1041409   ;;  %vm898_vm3 = vcmask 1041408   ;;  %s1277_s25 = smov [#allocation2]  }
  0x22   :  { %1128 = vmatprep.mubr.msk.bf16.mxu1 %vm273_vm0, %v1240_v18  ;;  %v1241_v21 = vld [vmem:[%s1603_s0 + $0xc8] sm:$0xff]   ;;  %v1242_v22 = vld [vmem:[%s1603_s0 + $0xd0] sm:$0xff]   ;;  %v1228_v24 = vld [vmem:[%s1603_s0 + $0x60] sm:$0xff]   ;;  %s944_s26 = sshll.u32 %s1277_s25, 4  ;;  %s945_s26 = int_to_ptr.vmem [resolvable:$true] %s944_s26 }
  0x23   :  { %v1243_v25 = vld [vmem:[%s1603_s0 + $0xd8] sm:$0xff]   ;;  %v1244_v26 = vld [vmem:[%s1603_s0 + $0xe0] sm:$0xff]   ;;  %v1229_v27 = vld [vmem:[%s1603_s0 + $0x68] sm:$0xff]   ;;  %s1250_s27 = scalar_lea.vmem %s945_s26, 32  ;;  %p1255_p1 = scmp.lt.s32.totalorder %s945_s26, %s945_s26 }
  0x24   :  { %v1230_v28 = vld [vmem:[%s1603_s0 + $0x70] sm:$0xff]   ;;  %v1245_v29 = vld [vmem:[%s1603_s0 + $0xe8] sm:$0xff]   ;;  %v1231_v31 = vld [vmem:[%s1603_s0 + $0x78] sm:$0xff]   ;;  %p1251_p0 = scmp.ne.s32.totalorder %s945_s26, %s1250_s27  ;;  %p1256_p2 = scmp.lt.s32.totalorder %s1250_s27, %s1250_s27 }
  0x25   :  { %v1246_v30 = vld [vmem:[%s1603_s0 + $0xf0] sm:$0xff]   ;;  %v1232_v32 = vld [vmem:[%s1603_s0 + $0x80] sm:$0xff]   ;;  %v1247_v33 = vld [vmem:[%s1603_s0 + $0xf8] sm:$0xff]  }
  0x26   :  { %1093 = vmatmul.mubr.msk.bf16.gmra.mrb[12].mxu0 %vm273_vm0, %v1223_v15  ;;  %v1233_v34 = vld [vmem:[%s1603_s0 + $0x88] sm:$0xff]   ;;  %v800_v35 = vld [vmem:[%s1605_s2] sm:$0xff]  ;;  %v802_v39 = vld [vmem:[%s1605_s2 + $0x10] sm:$0xff]  ;;  %p1257_p3 = por %p1256_p2, %p1255_p1 }
  0x27   :  { %1096 = vmatprep.mubr.msk.bf16.mxu0 %vm273_vm0, %v1224_v16  ;;  %v801_v36 = vld [vmem:[%s1605_s2 + $0x8] sm:$0xff]  ;;  %v803_v40 = vld [vmem:[%s1605_s2 + $0x18] sm:$0xff]  ;;  %v804_v42 = vld [vmem:[%s1605_s2 + $0x20] sm:$0xff] }
  0x28   :  { %v1180_v38 = vpack.c.bf16 %v801_v36, %v800_v35  ;;  %v1183_v41 = vpack.c.bf16 %v803_v40, %v802_v39  ;;  %v805_v43 = vld [vmem:[%s1605_s2 + $0x28] sm:$0xff]  ;;  %v806_v45 = vld [vmem:[%s1605_s2 + $0x30] sm:$0xff]  ;;  %v807_v46 = vld [vmem:[%s1605_s2 + $0x38] sm:$0xff]  ;;  %p1258_p4 = pnand %p1257_p3, %p1251_p0 }
  0x29   :  { %1129 = vmatmul.mubr.msk.bf16.gmra.mrb[12].mxu1 %vm273_vm0, %v1241_v21  ;;  %v1186_v44 = vpack.c.bf16 %v805_v43, %v804_v42  ;;  %v1189_v47 = vpack.c.bf16 %v807_v46, %v806_v45  ;;  %v808_v48 = vld [vmem:[%s1605_s2 + $0x40] sm:$0xff]  ;;  %v809_v49 = vld [vmem:[%s1605_s2 + $0x48] sm:$0xff]  ;;  %v810_v57 = vld [vmem:[%s1605_s2 + $0x50] sm:$0xff] }
  0x2a   :  { %1132 = vmatprep.mubr.msk.bf16.mxu1 %vm273_vm0, %v1242_v22  ;;  %1181 = vmatpush3.bf16.msra.mxu1 %v1180_v38  ;;  %v1192_v50 = vpack.c.bf16 %v809_v49, %v808_v48  ;;  %v811_v58 = vld [vmem:[%s1605_s2 + $0x58] sm:$0xff]  ;;  %v812_v2 = vld [vmem:[%s1605_s2 + $0x60] sm:$0xff]  ;;  %v813_v3 = vld [vmem:[%s1605_s2 + $0x68] sm:$0xff] }
  0x2b   :  { %1182 = vmatprep.subr.bf16.mxu1 %v1274_v37  ;;  %v1195_v61 = vpack.c.bf16 %v811_v58, %v810_v57  ;;  %v1198_v8 = vpack.c.bf16 %v813_v3, %v812_v2  ;;  %v814_v14 = vld [vmem:[%s1605_s2 + $0x70] sm:$0xff]  ;;  %v815_v15 = vld [vmem:[%s1605_s2 + $0x78] sm:$0xff] }
  0x2c   :  { %v1201_v17 = vpack.c.bf16 %v815_v15, %v814_v14 }
  0x2e   :  { %1097 = vmatmul.mubr.msk.bf16.gmra.mrb[16].mxu0 %vm273_vm0, %v1225_v19  ;;  %1184 = vmatpush3.bf16.msra.mxu1 %v1183_v41 }
  0x2f   :  { %1100 = vmatprep.mubr.msk.bf16.mxu0 %vm273_vm0, %v1226_v20  ;;  %1185 = vmatprep.subr.bf16.mxu1 %v1274_v37  ;;  %v1276_v20 = vmov 0.0  }
  0x31   :  { %1133 = vmatmul.mubr.msk.bf16.gmra.mrb[16].mxu1 %vm273_vm0, %v1243_v25 }
  0x32   :  { %1136 = vmatprep.mubr.msk.bf16.mxu1 %vm273_vm0, %v1244_v26  ;;  %1187 = vmatpush3.bf16.msra.mxu1 %v1186_v44 }
  0x33   :  { %1188 = vmatprep.subr.bf16.mxu1 %v1274_v37 }
  0x36   :  { %1101 = vmatmul.mubr.msk.bf16.gmra.mrb[20].mxu0 %vm273_vm0, %v1227_v23  ;;  %1190 = vmatpush3.bf16.msra.mxu1 %v1189_v47 }
  0x37   :  { %1104 = vmatprep.mubr.msk.bf16.mxu0 %vm273_vm0, %v1228_v24  ;;  %1191 = vmatprep.subr.bf16.mxu1 %v1274_v37 }
  0x39   :  { %1137 = vmatmul.mubr.msk.bf16.gmra.mrb[20].mxu1 %vm273_vm0, %v1245_v29 }
  0x3a   :  { %1140 = vmatprep.mubr.msk.bf16.mxu1 %vm273_vm0, %v1246_v30  ;;  %1193 = vmatpush3.bf16.msra.mxu1 %v1192_v50 }
  0x3b   :  { %1194 = vmatprep.subr.bf16.mxu1 %v1274_v37 }
  0x3e   :  { %1105 = vmatmul.mubr.msk.bf16.gmra.mrb[24].mxu0 %vm273_vm0, %v1229_v27  ;;  %1196 = vmatpush3.bf16.msra.mxu1 %v1195_v61 }
  0x3f   :  { %1108 = vmatprep.mubr.msk.bf16.mxu0 %vm273_vm0, %v1230_v28  ;;  %1197 = vmatprep.subr.bf16.mxu1 %v1274_v37 }
  0x41   :  { %1141 = vmatmul.mubr.msk.bf16.gmra.mrb[24].mxu1 %vm273_vm0, %v1247_v33 }
  0x42   :  { %1199 = vmatpush3.bf16.msra.mxu1 %v1198_v8  ;;  %1176 = vmatprep.mubr.msk.f32.mxu1 %vm1275_vm1, %v1276_v20 }
  0x43   :  { %1200 = vmatprep.subr.bf16.mxu1 %v1274_v37 }
  0x46   :  { %1109 = vmatmul.mubr.msk.bf16.gmra.mrb[28].mxu0 %vm273_vm0, %v1231_v31  ;;  %1202 = vmatpush3.bf16.msra.mxu1 %v1201_v17 }
  0x47   :  { %1112 = vmatprep.mubr.msk.bf16.mxu0 %vm273_vm0, %v1232_v32 }
  0x4e   :  { %1113 = vmatmul.mubr.msk.bf16.gmra.mrb[32].mxu0 %vm273_vm0, %v1233_v34 }
  0xe1   :  { %v1082_v51 = vpop.f32.mrb[0].mxu0  ;;  %v1492_v7 = vpop.f32.mrb[0].mxu1 }
  0xe2   :  { %v404_v52 = vpop.f32.mrb[1].mxu0  ;;  %v661_v59 = vmax.f32 %v1082_v51, 0.0  ;;  %v1494_v10 = vpop.f32.mrb[1].mxu1 }
  0xe3   :  { %v1083_v53 = vpop.f32.mrb[2].mxu0  ;;  %v659_v55 = vmax.f32 %v404_v52, 0.0  ;;  %v1496_v13 = vpop.f32.mrb[2].mxu1 }
  0xe4   :  { %v407_v54 = vpop.f32.mrb[3].mxu0  ;;  %v662_v62 = vmax.f32 %v1083_v53, 0.0  ;;  %v1504_v16 = vpop.f32.mrb[3].mxu1 }
  0xe5   :  { %v660_v56 = vmax.f32 %v407_v54, 0.0 }
  0xe7   :  { %v723_v60 = vadd.f32 %v660_v56, %v659_v55 }
  0xe9   :  { %v724_v63 = vadd.f32 %v723_v60, %v661_v59  ;;  %v1086_v0 = vpop.f32.mrb[4].mxu0  ;;  %v1506_v28 = vpop.f32.mrb[4].mxu1 }
  0xea   :  { %v420_v1 = vpop.f32.mrb[5].mxu0  ;;  %v665_v18 = vmax.f32 %v1086_v0, 0.0  ;;  %v1508_v30 = vpop.f32.mrb[5].mxu1 }
  0xeb   :  { %v663_v4 = vmax.f32 %v420_v1, 0.0  ;;  %v725_v5 = vadd.f32 %v724_v63, %v662_v62  ;;  %v1087_v6 = vpop.f32.mrb[6].mxu0  ;;  %v1510_v33 = vpop.f32.mrb[6].mxu1 }
  0xec   :  { %v423_v9 = vpop.f32.mrb[7].mxu0  ;;  %v666_v21 = vmax.f32 %v1087_v6, 0.0  ;;  %v1512_v34 = vpop.f32.mrb[7].mxu1 }
  0xed   :  { %v726_v11 = vadd.f32 %v725_v5, %v663_v4  ;;  %v664_v12 = vmax.f32 %v423_v9, 0.0 }
  0xef   :  { %v727_v19 = vadd.f32 %v726_v11, %v664_v12 }
  0xf1   :  { %v728_v22 = vadd.f32 %v727_v19, %v665_v18  ;;  %v1090_v23 = vpop.f32.mrb[8].mxu0 }
  0xf2   :  { %v436_v24 = vpop.f32.mrb[9].mxu0  ;;  %v669_v35 = vmax.f32 %v1090_v23, 0.0 }
  0xf3   :  { %v667_v25 = vmax.f32 %v436_v24, 0.0  ;;  %v729_v26 = vadd.f32 %v728_v22, %v666_v21  ;;  %v1091_v27 = vpop.f32.mrb[10].mxu0 }
  0xf4   :  { %v439_v29 = vpop.f32.mrb[11].mxu0  ;;  %v670_v37 = vmax.f32 %v1091_v27, 0.0  ;;  %v1514_v44 = vpop.f32.mrb[8].mxu1 }
  0xf5   :  { %v730_v31 = vadd.f32 %v729_v26, %v667_v25  ;;  %v668_v32 = vmax.f32 %v439_v29, 0.0  ;;  %v1516_v46 = vpop.f32.mrb[9].mxu1 }
  0xf6   :  { %v1518_v49 = vpop.f32.mrb[10].mxu1 }
  0xf7   :  { %v731_v36 = vadd.f32 %v730_v31, %v668_v32  ;;  %v1520_v50 = vpop.f32.mrb[11].mxu1 }
  0xf9   :  { %v732_v38 = vadd.f32 %v731_v36, %v669_v35  ;;  %v1094_v39 = vpop.f32.mrb[12].mxu0 }
  0xfa   :  { %v452_v40 = vpop.f32.mrb[13].mxu0  ;;  %v673_v51 = vmax.f32 %v1094_v39, 0.0 }
  0xfb   :  { %v671_v41 = vmax.f32 %v452_v40, 0.0  ;;  %v733_v42 = vadd.f32 %v732_v38, %v670_v37  ;;  %v1095_v43 = vpop.f32.mrb[14].mxu0 }
  0xfc   :  { %v455_v45 = vpop.f32.mrb[15].mxu0  ;;  %v674_v53 = vmax.f32 %v1095_v43, 0.0  ;;  %v1522_v60 = vpop.f32.mrb[12].mxu1 }
  0xfd   :  { %v734_v47 = vadd.f32 %v733_v42, %v671_v41  ;;  %v672_v48 = vmax.f32 %v455_v45, 0.0  ;;  %v1524_v62 = vpop.f32.mrb[13].mxu1 }
  0xfe   :  { %v1526_v1 = vpop.f32.mrb[14].mxu1 }
  0xff   :  { %v735_v52 = vadd.f32 %v734_v47, %v672_v48  ;;  %v1528_v2 = vpop.f32.mrb[15].mxu1 }
 0x101   :  { %v736_v54 = vadd.f32 %v735_v52, %v673_v51  ;;  %v1098_v55 = vpop.f32.mrb[16].mxu0 }
 0x102   :  { %v468_v56 = vpop.f32.mrb[17].mxu0  ;;  %v677_v3 = vmax.f32 %v1098_v55, 0.0 }
 0x103   :  { %v675_v57 = vmax.f32 %v468_v56, 0.0  ;;  %v737_v58 = vadd.f32 %v736_v54, %v674_v53  ;;  %v1099_v59 = vpop.f32.mrb[18].mxu0 }
 0x104   :  { %v471_v61 = vpop.f32.mrb[19].mxu0  ;;  %v678_v5 = vmax.f32 %v1099_v59, 0.0  ;;  %v1530_v15 = vpop.f32.mrb[16].mxu1 }
 0x105   :  { %v738_v63 = vadd.f32 %v737_v58, %v675_v57  ;;  %v676_v0 = vmax.f32 %v471_v61, 0.0  ;;  %v1532_v18 = vpop.f32.mrb[17].mxu1 }
 0x106   :  { %v1534_v21 = vpop.f32.mrb[18].mxu1 }
 0x107   :  { %v739_v4 = vadd.f32 %v738_v63, %v676_v0  ;;  %v1536_v22 = vpop.f32.mrb[19].mxu1 }
 0x109   :  { %v740_v6 = vadd.f32 %v739_v4, %v677_v3  ;;  %v1102_v8 = vpop.f32.mrb[20].mxu0 }
 0x10a   :  { %v484_v9 = vpop.f32.mrb[21].mxu0  ;;  %v681_v23 = vmax.f32 %v1102_v8, 0.0 }
 0x10b   :  { %v679_v11 = vmax.f32 %v484_v9, 0.0  ;;  %v741_v12 = vadd.f32 %v740_v6, %v678_v5  ;;  %v1103_v14 = vpop.f32.mrb[22].mxu0 }
 0x10c   :  { %v487_v17 = vpop.f32.mrb[23].mxu0  ;;  %v682_v25 = vmax.f32 %v1103_v14, 0.0  ;;  %v1538_v36 = vpop.f32.mrb[20].mxu1 }
 0x10d   :  { %v742_v19 = vadd.f32 %v741_v12, %v679_v11  ;;  %v680_v20 = vmax.f32 %v487_v17, 0.0  ;;  %v1540_v38 = vpop.f32.mrb[21].mxu1 }
 0x10e   :  { %v1542_v41 = vpop.f32.mrb[22].mxu1 }
 0x10f   :  { %v743_v24 = vadd.f32 %v742_v19, %v680_v20  ;;  %v1544_v42 = vpop.f32.mrb[23].mxu1 }
 0x111   :  { %v744_v26 = vadd.f32 %v743_v24, %v681_v23  ;;  %v1106_v27 = vpop.f32.mrb[24].mxu0 }
 0x112   :  { %v500_v29 = vpop.f32.mrb[25].mxu0  ;;  %v685_v43 = vmax.f32 %v1106_v27, 0.0 }
 0x113   :  { %v683_v31 = vmax.f32 %v500_v29, 0.0  ;;  %v745_v32 = vadd.f32 %v744_v26, %v682_v25  ;;  %v1107_v35 = vpop.f32.mrb[26].mxu0  ;;  %v695_v26 = vmax.f32 %v1494_v10, 0.0  ;;  %v702_v10 = vmax.f32 %v1510_v33, 0.0 }
 0x114   :  { %v503_v37 = vpop.f32.mrb[27].mxu0  ;;  %v686_v47 = vmax.f32 %v1107_v35, 0.0  ;;  %v1546_v56 = vpop.f32.mrb[24].mxu1  ;;  %v709_v33 = vmax.f32 %v1522_v60, 0.0 }
 0x115   :  { %v746_v39 = vadd.f32 %v745_v32, %v683_v31  ;;  %v684_v40 = vmax.f32 %v503_v37, 0.0  ;;  %v1548_v58 = vpop.f32.mrb[25].mxu1  ;;  %v696_v31 = vmax.f32 %v1504_v16, 0.0  ;;  %v697_v32 = vmax.f32 %v1492_v7, 0.0 }
 0x116   :  { %v1550_v63 = vpop.f32.mrb[26].mxu1  ;;  %v698_v37 = vmax.f32 %v1496_v13, 0.0  ;;  %v703_v16 = vmax.f32 %v1516_v46, 0.0  ;;  %v705_v13 = vmax.f32 %v1514_v44, 0.0  ;;  %v710_v46 = vmax.f32 %v1526_v1, 0.0 }
 0x117   :  { %v747_v45 = vadd.f32 %v746_v39, %v684_v40  ;;  %v1552_v0 = vpop.f32.mrb[27].mxu1  ;;  %v699_v40 = vmax.f32 %v1508_v30, 0.0  ;;  %v706_v30 = vmax.f32 %v1518_v49, 0.0  ;;  %v713_v49 = vmax.f32 %v1530_v15, 0.0 }
 0x118   :  { %v717_v1 = vmax.f32 %v1538_v36, 0.0 }
 0x119   :  { %v748_v48 = vadd.f32 %v747_v45, %v685_v43  ;;  %v1110_v51 = vpop.f32.mrb[28].mxu0 }
 0x11a   :  { %v516_v52 = vpop.f32.mrb[29].mxu0  ;;  %v689_v3 = vmax.f32 %v1110_v51, 0.0 }
 0x11b   :  { %v687_v53 = vmax.f32 %v516_v52, 0.0  ;;  %v749_v54 = vadd.f32 %v748_v48, %v686_v47  ;;  %v1111_v55 = vpop.f32.mrb[30].mxu0  ;;  %v700_v47 = vmax.f32 %v1512_v34, 0.0  ;;  %v701_v48 = vmax.f32 %v1506_v28, 0.0 }
 0x11c   :  { %v519_v57 = vpop.f32.mrb[31].mxu0  ;;  %v690_v5 = vmax.f32 %v1111_v55, 0.0  ;;  %v707_v34 = vmax.f32 %v1524_v62, 0.0  ;;  %v714_v62 = vmax.f32 %v1534_v21, 0.0  ;;  %v720_v21 = vmax.f32 %v1552_v0, 0.0 }
 0x11d   :  { %v750_v59 = vadd.f32 %v749_v54, %v687_v53  ;;  %v688_v61 = vmax.f32 %v519_v57, 0.0  ;;  %v704_v54 = vmax.f32 %v1520_v50, 0.0  ;;  %v711_v50 = vmax.f32 %v1532_v18, 0.0 }
 0x11f   :  { %v751_v4 = vadd.f32 %v750_v59, %v688_v61  ;;  %v708_v61 = vmax.f32 %v1528_v2, 0.0  ;;  %v715_v2 = vmax.f32 %v1540_v38, 0.0  ;;  %v721_v38 = vmax.f32 %v1546_v56, 0.0  ;;  %v1019_v56 = vld [vmem:[%s1606_s3] ss:$0 sm:$0xff] }
 0x121   :  { %v752_v6 = vadd.f32 %v751_v4, %v689_v3  ;;  %v1114_v8 = vpop.f32.mrb[32].mxu0 }
 0x122   :  { %v532_v9 = vpop.f32.mrb[33].mxu0  ;;  %v693_v20 = vmax.f32 %v1114_v8, 0.0 }
 0x123   :  { %v753_v11 = vadd.f32 %v752_v6, %v690_v5  ;;  %v1115_v12 = vpop.f32.mrb[34].mxu0  ;;  %v691_v17 = vmax.f32 %v532_v9, 0.0  ;;  %v712_v6 = vmax.f32 %v1536_v22, 0.0  ;;  %v719_v22 = vmax.f32 %v1548_v58, 0.0 }
 0x124   :  { %v535_v14 = vpop.f32.mrb[35].mxu0  ;;  %v694_v24 = vmax.f32 %v1115_v12, 0.0 }
 0x125   :  { %v692_v19 = vmax.f32 %v535_v14, 0.0  ;;  %v716_v14 = vmax.f32 %v1544_v42, 0.0  ;;  %v754_v18 = vrot.slane %v753_v11, 4  ;;  %v722_v42 = vmax.f32 %v1550_v63, 0.0 }
 0x127   :  { %v760_v23 = vadd.f32 %v692_v19, %v691_v17  ;;  %v718_v19 = vmax.f32 %v1542_v41, 0.0 }
 0x129   :  { %v761_v25 = vadd.f32 %v760_v23, %v693_v20  ;;  %v755_v23 = vadd.f32 %v754_v18, %v753_v11 }
 0x12b   :  { %v762_v27 = vadd.f32 %v761_v25, %v694_v24 }
 0x12d   :  { %v763_v29 = vadd.f32 %v762_v27, %v695_v26  ;;  %v756_v26 = vrot.slane %v755_v23, 2 }
 0x12f   :  { %v764_v35 = vadd.f32 %v763_v29, %v696_v31  ;;  %v757_v29 = vadd.f32 %v756_v26, %v755_v23 }
 0x131   :  { %v765_v39 = vadd.f32 %v764_v35, %v697_v32  ;;  %v758_v41 = vrot.slane %v757_v29, 1 }
 0x133   :  { %v766_v43 = vadd.f32 %v765_v39, %v698_v37  ;;  %v759_v39 = vadd.f32 %v758_v41, %v757_v29 }
 0x135   :  { %v767_v45 = vadd.f32 %v766_v43, %v699_v40  ;;  %v798_v40 = vmul.f32 0.00390625, %v759_v39 }
 0x137   :  { %v768_v51 = vadd.f32 %v767_v45, %v700_v47 }
 0x139   :  { %v769_v52 = vadd.f32 %v768_v51, %v701_v48 }
 0x13b   :  { %v770_v53 = vadd.f32 %v769_v52, %v702_v10 }
 0x13d   :  { %v771_v7 = vadd.f32 %v770_v53, %v703_v16 }
 0x13f   :  { %v772_v55 = vadd.f32 %v771_v7, %v704_v54 }
 0x141   :  { %v773_v57 = vadd.f32 %v772_v55, %v705_v13 }
 0x143   :  { %v774_v59 = vadd.f32 %v773_v57, %v706_v30 }
 0x145   :  { %v775_v28 = vadd.f32 %v774_v59, %v707_v34 }
 0x147   :  { %v776_v3 = vadd.f32 %v775_v28, %v708_v61 }
 0x149   :  { %v777_v4 = vadd.f32 %v776_v3, %v709_v33 }
 0x14b   :  { %v778_v5 = vadd.f32 %v777_v4, %v710_v46  ;;  %v1020_v4 = vld [vmem:[%s1607_s4] ss:$0 sm:$0xff] }
 0x14d   :  { %v779_v44 = vadd.f32 %v778_v5, %v711_v50 }
 0x14f   :  { %v780_v8 = vadd.f32 %v779_v44, %v712_v6  ;;  %v1021_v44 = vld [vmem:[%s1608_s5] ss:$0 sm:$0xff] }
 0x151   :  { %v781_v9 = vadd.f32 %v780_v8, %v713_v49 }
 0x153   :  { %v782_v12 = vadd.f32 %v781_v9, %v714_v62 }
 0x155   :  { %v783_v60 = vadd.f32 %v782_v12, %v715_v2 }
 0x157   :  { %v784_v17 = vadd.f32 %v783_v60, %v716_v14 }
 0x159   :  { %v785_v20 = vadd.f32 %v784_v17, %v717_v1 }
 0x15b   :  { %v786_v15 = vadd.f32 %v785_v20, %v718_v19 }
 0x15d   :  { %v787_v24 = vadd.f32 %v786_v15, %v719_v22 }
 0x15f   :  { %v788_v25 = vadd.f32 %v787_v24, %v720_v21 }
 0x161   :  { %v789_v27 = vadd.f32 %v788_v25, %v721_v38 }
 0x163   :  { %v790_v36 = vadd.f32 %v789_v27, %v722_v42 }
 0x165   :  { %v791_v31 = vrot.slane %v790_v36, 4 }
 0x167   :  { %v792_v32 = vadd.f32 %v791_v31, %v790_v36 }
 0x169   :  { %v793_v35 = vrot.slane %v792_v32, 2 }
 0x16b   :  { %v794_v37 = vadd.f32 %v793_v35, %v792_v32 }
 0x16d   :  { %v795_v58 = vrot.slane %v794_v37, 1 }
 0x16f   :  { %v796_v11 = vadd.f32 %v795_v58, %v794_v37 }
 0x171   :  { %v799_v0 = vmul.f32 0.00390625, %v796_v11 }
 0x173   :  { %v826_v43 = vsel %vm825_vm2, %v799_v0, %v798_v40 }
 0x174   :  { %1177 = vmatmul.mubr.f32.vlgmr.msra.gmra.mrb[28].mxu1 %v826_v43 }
 0x247   :  { %v894_v63 = vpop.f32.mrb[28].mxu1 }
 0x248   :  { %v895_v45 = vadd.f32 %v1019_v56, %v894_v63  ;;  %v1178_v47 = vpop.f32.mrb[29].mxu1 }
 0x24a   :  { %v899_v48 = vsel %vm898_vm3, %v895_v45, 0.0 }
 0x24b   :  { %v900_v51 = vrot.slane %v899_v48, 4 }
 0x24d   :  { %v901_v10 = vadd.f32 %v900_v51, %v899_v48 }
 0x24f   :  { %v902_v52 = vrot.slane %v901_v10, 2 }
 0x251   :  { %v903_v16 = vadd.f32 %v902_v52, %v901_v10 }
 0x253   :  { %v904_v53 = vrot.slane %v903_v16, 1 }
 0x255   :  { %v905_v7 = vadd.f32 %v904_v53, %v903_v16 }
 0x257   :  { %v907_v54 = vmul.f32 0.5, %v905_v7 }
 0x259   :  { %v908_v13 = vsub.f32 %v895_v45, %v907_v54 }
 0x25b   :  { %v909_v55 = vmul.f32 %v908_v13, %v908_v13  ;;  %v925_v50 = vmul.f32 %v1020_v4, %v908_v13 }
 0x25d   :  { %v910_v30 = vsel %vm898_vm3, %v909_v55, 0.0 }
 0x25e   :  { %v911_v57 = vrot.slane %v910_v30, 4 }
 0x260   :  { %v912_v34 = vadd.f32 %v911_v57, %v910_v30 }
 0x262   :  { %v913_v59 = vrot.slane %v912_v34, 2 }
 0x264   :  { %v914_v28 = vadd.f32 %v913_v59, %v912_v34 }
 0x266   :  { %v915_v61 = vrot.slane %v914_v28, 1 }
 0x268   :  { %v916_v33 = vadd.f32 %v915_v61, %v914_v28 }
 0x26a   :  { %v917_v3 = vmul.f32 0.5, %v916_v33 }
 0x26c   :  { %v926_v46 = vadd.f32 1e-05, %v917_v3 }
 0x26e   :  { %1248 = vrsqrt.f32 %v926_v46 }
 0x278   :  { %v1249_v5 = vpop.eup %1248 }
 0x279   :  { %v928_v6 = vmul.f32 %v1249_v5, %v925_v50 }
 0x27b   :  { %v936_v49 = vadd.f32 %v1021_v44, %v928_v6 }
 0x27d   :  { %937 = vst [vmem:[#allocation2] sm:$0x3] %v936_v49 }
 0x27e   :  { %1261 = shalt.err (!%p1258_p4)
}
 0x27f   :  { %s1262_s29 = scalar_lea.hbm %s1609_s6, 32 }
 0x280   :  { %p1263_p5 = scmp.ne.s32.totalorder %s1609_s6, %s1262_s29  ;;  %p1266_p6 = scmp.lt.u32.totalorder %s1262_s29, %s1609_s6 }
 0x282   :  { %p1268_p7 = pnand %p1266_p6, %p1263_p5 }
 0x284   :  { %1271 = shalt.err (!%p1268_p7)
}
 0x285   :  { %947 = dma.vmem_to_hbm [thread:$0]  %s945_s26, 32, %s1609_s6, [#allocation3]  }
 0x286   :  { %1272 = dma.done.wait [#allocation3], 32  }
 0x287   :  { %1273 = vsyncadd [#allocation3], 4294967264 }
 0x288   :  { %951 = vsyncpa [#allocation3], 1 }

</bundles_post_ra>
